<compile_context>
chip_gen: v5e
topology: v5e:2x2
jax: 0.10.0
libtpu: 0.0.40
codegen_flags: <defaults>
</compile_context>

<pallas_src>
import functools
import math

import jax
import jax.numpy as jnp
from jax.experimental import pallas as pl
from jax.experimental.pallas import tpu as pltpu

_MB = 1024 * 1024


# ---------------------------------------------------------------------------
# helpers
# ---------------------------------------------------------------------------

def _round_up(x, m):
    return ((x + m - 1) // m) * m


def _device_kind():
    try:
        return jax.devices()[0].device_kind.lower()
    except Exception:
        return ""


def _default_block_m():
    """MXU-matched row tile: 128 on 128-wide-MXU parts (v2-v5e), else 256."""
    kind = _device_kind()
    if any(t in kind for t in ("v2", "v3", "v4", "lite", "v5e")):
        return 128
    return 256


def _is_dual_tensorcore():
    """v7x has two TensorCores; only there does the grid need a >=2 parallel axis."""
    return "v7" in _device_kind()


def _pick_lane_tile(dp, *, prefer_split):
    """Feature (lane) tile for the matmul kernel.

    Caps the resident W.T tile at <= 8 MiB (bf16) and, on dual-TensorCore
    chips, prefers a tile that gives the parallel feature axis extent >= 2.
    """
    cands = [c for c in (512, 256, 128) if dp % c == 0 and dp * c * 2 <= 8 * _MB]
    if not cands:
        cands = [128] if dp % 128 == 0 else [dp]
    if prefer_split:
        for c in cands:
            if dp // c >= 2:
                return c
    return cands[0]


def _pick_bn_glu_tiles(mp, dp, vmem_budget_bytes=12 * _MB):
    """Large lane-dense tiles for the memory-bound BN-apply + GLU kernel."""
    if dp <= 4096:
        tn = dp                                     # full feature width
    else:
        tn = next((c for c in (4096, 2048, 1024, 512, 256, 128) if dp % c == 0),
                  dp)
    # bytes per row per tile: x f32 + x1 bf16 + out f32, double buffered
    bytes_per_row = tn * (4 + 2 + 4) * 2
    max_rows = max(8, vmem_budget_bytes // bytes_per_row)
    for c in (2048, 1024, 512, 256, 128, 64, 32, 16, 8):
        if c <= max_rows and mp % c == 0:
            return c, tn
    return (mp, tn) if mp <= max_rows else (8, tn)


# ---------------------------------------------------------------------------
# Kernel 1: Linear (bf16 MXU, f32 accumulate), optional batch-stat accumulation
# ---------------------------------------------------------------------------

def _linear_kernel(x_ref, w_ref, x1_ref):
    y = jnp.dot(x_ref[...].astype(jnp.bfloat16), w_ref[...],
                preferred_element_type=jnp.float32)
    x1_ref[...] = y.astype(x1_ref.dtype)


def _linear_stats_kernel(x_ref, w_ref, x1_ref, sum_ref, ssq_ref, *,
                         m_valid, block_m, mask_needed):
    # grid = (n_tiles, m_tiles); axis 0 = feature ("parallel"), axis 1 = rows
    # ("arbitrary" = stats reduction axis).
    mi = pl.program_id(1)

    @pl.when(mi == 0)
    def _():
        sum_ref[...] = jnp.zeros_like(sum_ref)
        ssq_ref[...] = jnp.zeros_like(ssq_ref)

    y = jnp.dot(x_ref[...].astype(jnp.bfloat16), w_ref[...],
                preferred_element_type=jnp.float32)
    # x1 is stored in a narrower dtype; statistics use the f32 value.
    x1_ref[...] = y.astype(x1_ref.dtype)

    if mask_needed:
        last = pl.num_programs(1) - 1

        @pl.when(mi < last)
        def _():
            sum_ref[...] += jnp.sum(y, axis=0, keepdims=True)
            ssq_ref[...] += jnp.sum(y * y, axis=0, keepdims=True)

        @pl.when(mi == last)  # only the last row tile can hold padded rows
        def _():
            row = mi * block_m + jax.lax.broadcasted_iota(
                jnp.int32, (block_m, 1), 0)
            yv = jnp.where(row < m_valid, y, 0.0)
            sum_ref[...] += jnp.sum(yv, axis=0, keepdims=True)
            ssq_ref[...] += jnp.sum(yv * yv, axis=0, keepdims=True)
    else:
        sum_ref[...] += jnp.sum(y, axis=0, keepdims=True)
        ssq_ref[...] += jnp.sum(y * y, axis=0, keepdims=True)


# ---------------------------------------------------------------------------
# Kernel 2: fused BatchNorm apply + GLU gate    out = x * sigmoid(x1*scale+shift)
# ---------------------------------------------------------------------------

def _bn_glu_kernel(x_ref, x1_ref, scale_ref, shift_ref, o_ref):
    z = x1_ref[...].astype(jnp.float32) * scale_ref[...] + shift_ref[...]
    o_ref[...] = x_ref[...] * jax.nn.sigmoid(z)


# ---------------------------------------------------------------------------
# Wrapper
# ---------------------------------------------------------------------------

def context_gating(x, params, *, add_batch_norm=True, training=True,
                   eps=1e-5, block_m=None, x1_dtype=jnp.bfloat16):
    """x: (B, D) float32.  params: dict with 'w' (D,D, PyTorch (out,in) layout),
    'b', 'gamma', 'beta', 'running_mean', 'running_var'."""
    M, D = x.shape
    x = x.astype(jnp.float32)
    Dp = _round_up(D, 128)

    bm = int(block_m) if block_m is not None else _default_block_m()
    # keep the double-buffered bf16 x tile within budget for very wide features
    while bm > 128 and bm * Dp * 2 * 2 > 24 * _MB:
        bm //= 2
    if M <= bm:
        Mp = _round_up(max(M, 8), 8)
        bm = Mp
    else:
        Mp = _round_up(M, bm)
    mt = Mp // bm

    tn = _pick_lane_tile(Dp, prefer_split=_is_dual_tensorcore())
    nt = Dp // tn

    need_pad = (Mp != M) or (Dp != D)
    x_p = x if not need_pad else jnp.pad(x, ((0, Mp - M), (0, Dp - D)))
    # The MXU wants bf16 operands.  When the feature axis is split (nt > 1) x
    # is streamed nt times, so pre-cast once; otherwise cast inside the kernel
    # and skip the extra HBM round trip entirely.
    x_lin = x_p.astype(jnp.bfloat16) if nt > 1 else x_p

    # Linear weight is (out, in); the matmul consumes W.T = (in=K, out=N).
    w_t = jnp.transpose(params["w"]).astype(jnp.bfloat16)
    if Dp != D:
        w_t = jnp.pad(w_t, ((0, Dp - D), (0, Dp - D)))

    need_stats = bool(add_batch_norm) and bool(training)
    x_bytes = jnp.dtype(x_lin.dtype).itemsize
    x1_bytes = jnp.dtype(x1_dtype).itemsize

    lin_cost = pl.CostEstimate(
        flops=2 * Mp * Dp * Dp,
        transcendentals=0,
        bytes_accessed=(nt * Mp * Dp * x_bytes      # x is re-read per feature tile
                        + Dp * Dp * 2               # W.T, each tile fetched once
                        + Mp * Dp * x1_bytes        # x1 writeback
                        + 2 * Dp * 4))              # column sum / sum-of-squares

    def _lin_vmem_need(w_buffers):
        return (2 * bm * Dp * x_bytes               # x tile, double buffered
                + w_buffers * Dp * tn * 2           # resident W.T tile
                + 2 * bm * tn * x1_bytes            # x1 tile, double buffered
                + 4 * tn * 4 * 2)                   # stats accumulators

    def _run_linear(use_buffered_w):
        w_kw = dict(pipeline_mode=pl.Buffered(1)) if use_buffered_w else {}
        in_specs = [
            pl.BlockSpec((bm, Dp), lambda ni, mi: (mi, 0)),        # x rows
            pl.BlockSpec((Dp, tn), lambda ni, mi: (0, ni), **w_kw),  # W.T cols
        ]
        need = _lin_vmem_need(1 if use_buffered_w else 2)
        vmem_limit = (None if need < 12 * _MB
                      else min(int(1.5 * need) + 4 * _MB, 48 * _MB))
        cparams = pltpu.CompilerParams(
            dimension_semantics=("parallel", "arbitrary"),
            vmem_limit_bytes=vmem_limit)
        if need_stats:
            kernel = functools.partial(_linear_stats_kernel, m_valid=M,
                                       block_m=bm, mask_needed=(Mp != M))
            out_specs = [
                pl.BlockSpec((bm, tn), lambda ni, mi: (mi, ni)),   # x1
                pl.BlockSpec((1, tn), lambda ni, mi: (0, ni)),     # column sums
                pl.BlockSpec((1, tn), lambda ni, mi: (0, ni)),     # column ssq
            ]
            out_shape = [
                jax.ShapeDtypeStruct((Mp, Dp), x1_dtype),
                jax.ShapeDtypeStruct((1, Dp), jnp.float32),
                jax.ShapeDtypeStruct((1, Dp), jnp.float32),
            ]
        else:
            kernel = _linear_kernel
            out_specs = pl.BlockSpec((bm, tn), lambda ni, mi: (mi, ni))
            out_shape = jax.ShapeDtypeStruct((Mp, Dp), x1_dtype)
        return pl.pallas_call(
            kernel,
            grid=(nt, mt),
            in_specs=in_specs,
            out_specs=out_specs,
            out_shape=out_shape,
            compiler_params=cparams,
            cost_estimate=lin_cost,
        )(x_lin, w_t)

    try:
        lin_out = _run_linear(True)
    except Exception:
        # pl.Buffered(1) (single-buffered resident W tile) unsupported on this
        # JAX/Mosaic version -> fall back to default double buffering.
        lin_out = _run_linear(False)

    if need_stats:
        x1, sums, ssqs = lin_out
    else:
        x1 = lin_out
        sums = ssqs = None

    # ---- fold BatchNorm1d (+ the Linear bias) into per-feature scale/shift ----
    b = params["b"].astype(jnp.float32)
    if add_batch_norm:
        gamma = params["gamma"].astype(jnp.float32)
        beta = params["beta"].astype(jnp.float32)
        if training:
            mean_y = sums[0, :D] / M
            var = jnp.maximum(ssqs[0, :D] / M - mean_y * mean_y, 0.0)  # biased
            scale = gamma * jax.lax.rsqrt(var + eps)
            shift = beta - mean_y * scale          # Linear bias cancels exactly
        else:
            rm = params["running_mean"].astype(jnp.float32)
            rv = params["running_var"].astype(jnp.float32)
            scale = gamma * jax.lax.rsqrt(rv + eps)
            shift = beta + (b - rm) * scale
    else:
        scale = jnp.ones((D,), jnp.float32)
        shift = b
    if Dp != D:
        scale = jnp.pad(scale, (0, Dp - D))
        shift = jnp.pad(shift, (0, Dp - D))
    scale_p = scale.reshape(1, Dp)
    shift_p = shift.reshape(1, Dp)

    # ---- memory-bound BN-apply + GLU with its own (large) tiling ----
    bm2, tn2 = _pick_bn_glu_tiles(Mp, Dp)
    mt2, nt2 = Mp // bm2, Dp // tn2
    glu_need = 2 * bm2 * tn2 * (4 + x1_bytes + 4) + 4 * tn2 * 4
    glu_vmem = (None if glu_need < 12 * _MB
                else min(int(1.5 * glu_need) + 4 * _MB, 48 * _MB))

    out = pl.pallas_call(
        _bn_glu_kernel,
        grid=(mt2, nt2),
        in_specs=[
            pl.BlockSpec((bm2, tn2), lambda mi, ni: (mi, ni)),  # original x (f32)
            pl.BlockSpec((bm2, tn2), lambda mi, ni: (mi, ni)),  # x1 (bf16)
            pl.BlockSpec((1, tn2), lambda mi, ni: (0, ni)),     # scale
            pl.BlockSpec((1, tn2), lambda mi, ni: (0, ni)),     # shift
        ],
        out_specs=pl.BlockSpec((bm2, tn2), lambda mi, ni: (mi, ni)),
        out_shape=jax.ShapeDtypeStruct((Mp, Dp), jnp.float32),
        compiler_params=pltpu.CompilerParams(
            dimension_semantics=("parallel", "parallel"),
            vmem_limit_bytes=glu_vmem),
        cost_estimate=pl.CostEstimate(
            flops=3 * Mp * Dp,
            transcendentals=Mp * Dp,
            bytes_accessed=Mp * Dp * (4 + x1_bytes + 4) + 2 * Dp * 4),
    )(x_p, x1, scale_p, shift_p)

    if need_pad:
        out = out[:M, :D]
    return out


# ---------------------------------------------------------------------------
# Pure-JAX reference (f32 everywhere after the bf16-operand MXU matmul recipe)
# ---------------------------------------------------------------------------

def context_gating_reference(x, params, *, add_batch_norm=True, training=True,
                             eps=1e-5):
    w_t = jnp.transpose(params["w"]).astype(jnp.bfloat16)
    x1 = jnp.dot(x.astype(jnp.bfloat16), w_t,
                 preferred_element_type=jnp.float32) + params["b"]
    if add_batch_norm:
        if training:
            mean = jnp.mean(x1, axis=0)
            var = jnp.mean((x1 - mean) ** 2, axis=0)  # biased, as PyTorch BN fwd
        else:
            mean = params["running_mean"]
            var = params["running_var"]
        x1 = (x1 - mean) * jax.lax.rsqrt(var + eps) * params["gamma"] \
             + params["beta"]
    return x * jax.nn.sigmoid(x1)


# ---------------------------------------------------------------------------

if __name__ == "__main__":
    key = jax.random.PRNGKey(0)
    B, D = 8, 32
    kx, kw, kb = jax.random.split(key, 3)

    x = jax.random.normal(kx, (B, D), jnp.float32)

    bound = 1.0 / math.sqrt(D)   # nn.Linear default init range
    params = {
        "w": jax.random.uniform(kw, (D, D), jnp.float32, -bound, bound),
        "b": jax.random.uniform(kb, (D,), jnp.float32, -bound, bound),
        "gamma": jnp.ones((D,), jnp.float32),          # BatchNorm1d defaults
        "beta": jnp.zeros((D,), jnp.float32),
        "running_mean": jnp.zeros((D,), jnp.float32),
        "running_var": jnp.ones((D,), jnp.float32),
    }

    out = jax.block_until_ready(context_gating(x, params))
    ref = context_gating_reference(x, params)

    assert out.shape == (B, D), out.shape
    assert bool(jnp.all(jnp.isfinite(out)))
    # bf16 MXU operands + bf16 x1 intermediate => ~2^-9 relative error on the
    # pre-sigmoid activation; 1e-2 comfortably covers it at these magnitudes.
    max_err = float(jnp.max(jnp.abs(out - ref)))
    assert bool(jnp.allclose(out, ref, atol=1e-2, rtol=1e-2)), max_err
    print("KERNEL_OK")
</pallas_src>

<mosaic_0001>
module attributes {stable_mosaic.version = 11 : i64} {
  func.func @_linear_stats_kernel(%arg0: i32, %arg1: i32, %arg2: memref<8x128xf32, #tpu.memory_space<vmem>>, %arg3: memref<128x128xbf16, #tpu.memory_space<vmem>>, %arg4: memref<8x128xbf16, #tpu.memory_space<vmem>>, %arg5: memref<1x128xf32, #tpu.memory_space<vmem>>, %arg6: memref<1x128xf32, #tpu.memory_space<vmem>>) attributes {dimension_semantics = [#tpu.dimension_semantics<parallel>, #tpu.dimension_semantics<arbitrary>], iteration_bounds = array<i64: 1, 1>, scalar_prefetch = 0 : i64, scratch_operands = 0 : i64, tpu.core_type = #tpu.core_type<tc>, window_params = [{transform_indices = @transform_0, window_bounds = array<i64: 8, 128>}, {pipeline_mode = #tpu.pipeline_mode<synchronous>, transform_indices = @transform_1, window_bounds = array<i64: 128, 128>}, {transform_indices = @transform_2, window_bounds = array<i64: 8, 128>}, {transform_indices = @transform_3, window_bounds = array<i64: 1, 128>}, {transform_indices = @transform_4, window_bounds = array<i64: 1, 128>}]} {
    %c0_i32 = arith.constant 0 : i32
    %0 = arith.cmpi eq, %arg1, %c0_i32 : i32
    %1 = arith.extui %0 : i1 to i32
    %c0_i32_0 = arith.constant 0 : i32
    %2 = arith.cmpi ne, %1, %c0_i32_0 : i32
    scf.if %2 {
      %cst_16 = arith.constant 0.000000e+00 : f32
      %20 = vector.broadcast %cst_16 : f32 to vector<1x128xf32>
      %c0_17 = arith.constant 0 : index
      %c0_18 = arith.constant 0 : index
      %21 = vector.load %arg5[%c0_17, %c0_18] : memref<1x128xf32, #tpu.memory_space<vmem>>, vector<1x128xf32>
      tpu.vector_store %arg5[%c0_17, %c0_18], %20 {strides = array<i32>} : memref<1x128xf32, #tpu.memory_space<vmem>>, vector<1x128xf32>,
      %cst_19 = arith.constant 0.000000e+00 : f32
      %22 = vector.broadcast %cst_19 : f32 to vector<1x128xf32>
      %c0_20 = arith.constant 0 : index
      %c0_21 = arith.constant 0 : index
      %23 = vector.load %arg6[%c0_20, %c0_21] : memref<1x128xf32, #tpu.memory_space<vmem>>, vector<1x128xf32>
      tpu.vector_store %arg6[%c0_20, %c0_21], %22 {strides = array<i32>} : memref<1x128xf32, #tpu.memory_space<vmem>>, vector<1x128xf32>,
    } else {
    }
    %c0 = arith.constant 0 : index
    %c0_1 = arith.constant 0 : index
    %3 = vector.load %arg2[%c0, %c0_1] : memref<8x128xf32, #tpu.memory_space<vmem>>, vector<8x128xf32>
    %4 = arith.truncf %3 : vector<8x128xf32> to vector<8x128xbf16>
    %c0_2 = arith.constant 0 : index
    %c0_3 = arith.constant 0 : index
    %5 = vector.load %arg3[%c0_2, %c0_3] : memref<128x128xbf16, #tpu.memory_space<vmem>>, vector<128x128xbf16>
    %cst = arith.constant dense<0.000000e+00> : vector<8x128xf32>
    %6 = tpu.matmul %4, %5, %cst {dimension_numbers = #tpu.dot_dimension_numbers<[1], [0], [0], [1], [0, 0, 1, 1], [], []>} : vector<8x128xbf16>, vector<128x128xbf16>, vector<8x128xf32> -> vector<8x128xf32>
    %7 = arith.truncf %6 : vector<8x128xf32> to vector<8x128xbf16>
    %c0_4 = arith.constant 0 : index
    %c0_5 = arith.constant 0 : index
    %8 = vector.load %arg4[%c0_4, %c0_5] : memref<8x128xbf16, #tpu.memory_space<vmem>>, vector<8x128xbf16>
    tpu.vector_store %arg4[%c0_4, %c0_5], %7 {strides = array<i32>} : memref<8x128xbf16, #tpu.memory_space<vmem>>, vector<8x128xbf16>,
    %c0_6 = arith.constant 0 : index
    %c0_7 = arith.constant 0 : index
    %9 = vector.load %arg5[%c0_6, %c0_7] : memref<1x128xf32, #tpu.memory_space<vmem>>, vector<1x128xf32>
    %cst_8 = arith.constant dense<0.000000e+00> : vector<128xf32>
    %10 = vector.multi_reduction <add>, %6, %cst_8 [0] : vector<8x128xf32> to vector<128xf32>
    %11 = vector.shape_cast %10 : vector<128xf32> to vector<1x128xf32>
    %12 = arith.addf %9, %11 : vector<1x128xf32>
    %c0_9 = arith.constant 0 : index
    %c0_10 = arith.constant 0 : index
    %13 = vector.load %arg5[%c0_9, %c0_10] : memref<1x128xf32, #tpu.memory_space<vmem>>, vector<1x128xf32>
    tpu.vector_store %arg5[%c0_9, %c0_10], %12 {strides = array<i32>} : memref<1x128xf32, #tpu.memory_space<vmem>>, vector<1x128xf32>,
    %c0_11 = arith.constant 0 : index
    %c0_12 = arith.constant 0 : index
    %14 = vector.load %arg6[%c0_11, %c0_12] : memref<1x128xf32, #tpu.memory_space<vmem>>, vector<1x128xf32>
    %15 = arith.mulf %6, %6 : vector<8x128xf32>
    %cst_13 = arith.constant dense<0.000000e+00> : vector<128xf32>
    %16 = vector.multi_reduction <add>, %15, %cst_13 [0] : vector<8x128xf32> to vector<128xf32>
    %17 = vector.shape_cast %16 : vector<128xf32> to vector<1x128xf32>
    %18 = arith.addf %14, %17 : vector<1x128xf32>
    %c0_14 = arith.constant 0 : index
    %c0_15 = arith.constant 0 : index
    %19 = vector.load %arg6[%c0_14, %c0_15] : memref<1x128xf32, #tpu.memory_space<vmem>>, vector<1x128xf32>
    tpu.vector_store %arg6[%c0_14, %c0_15], %18 {strides = array<i32>} : memref<1x128xf32, #tpu.memory_space<vmem>>, vector<1x128xf32>,
    return
  }
  func.func @transform_0(%arg0: i32, %arg1: i32) -> (i32, i32) {
    %c0_i32 = arith.constant 0 : i32
    %c0_i32_0 = arith.constant 0 : i32
    return %arg1, %c0_i32 : i32, i32
  }
  func.func @transform_1(%arg0: i32, %arg1: i32) -> (i32, i32) {
    %c0_i32 = arith.constant 0 : i32
    %c0_i32_0 = arith.constant 0 : i32
    return %c0_i32, %arg0 : i32, i32
  }
  func.func @transform_2(%arg0: i32, %arg1: i32) -> (i32, i32) {
    %c0_i32 = arith.constant 0 : i32
    return %arg1, %arg0 : i32, i32
  }
  func.func @transform_3(%arg0: i32, %arg1: i32) -> (i32, i32) {
    %c0_i32 = arith.constant 0 : i32
    %c0_i32_0 = arith.constant 0 : i32
    return %c0_i32, %arg0 : i32, i32
  }
  func.func @transform_4(%arg0: i32, %arg1: i32) -> (i32, i32) {
    %c0_i32 = arith.constant 0 : i32
    %c0_i32_0 = arith.constant 0 : i32
    return %c0_i32, %arg0 : i32, i32
  }
}

module attributes {stable_mosaic.version = 11 : i64} {
  func.func @_linear_stats_kernel(%arg0: i32, %arg1: i32, %arg2: memref<8x128xf32, #tpu.memory_space<vmem>>, %arg3: memref<128x128xbf16, #tpu.memory_space<vmem>>, %arg4: memref<8x128xbf16, #tpu.memory_space<vmem>>, %arg5: memref<1x128xf32, #tpu.memory_space<vmem>>, %arg6: memref<1x128xf32, #tpu.memory_space<vmem>>) attributes {dimension_semantics = [#tpu.dimension_semantics<parallel>, #tpu.dimension_semantics<arbitrary>], iteration_bounds = array<i64: 1, 1>, scalar_prefetch = 0 : i64, scratch_operands = 0 : i64, tpu.core_type = #tpu.core_type<tc>, window_params = [{transform_indices = @transform_0, window_bounds = array<i64: 8, 128>}, {transform_indices = @transform_1, window_bounds = array<i64: 128, 128>}, {transform_indices = @transform_2, window_bounds = array<i64: 8, 128>}, {transform_indices = @transform_3, window_bounds = array<i64: 1, 128>}, {transform_indices = @transform_4, window_bounds = array<i64: 1, 128>}]} {
    %c0_i32 = arith.constant 0 : i32
    %0 = arith.cmpi eq, %arg1, %c0_i32 : i32
    %1 = arith.extui %0 : i1 to i32
    %c0_i32_0 = arith.constant 0 : i32
    %2 = arith.cmpi ne, %1, %c0_i32_0 : i32
    scf.if %2 {
      %cst_16 = arith.constant 0.000000e+00 : f32
      %20 = vector.broadcast %cst_16 : f32 to vector<1x128xf32>
      %c0_17 = arith.constant 0 : index
      %c0_18 = arith.constant 0 : index
      %21 = vector.load %arg5[%c0_17, %c0_18] : memref<1x128xf32, #tpu.memory_space<vmem>>, vector<1x128xf32>
      tpu.vector_store %arg5[%c0_17, %c0_18], %20 {strides = array<i32>} : memref<1x128xf32, #tpu.memory_space<vmem>>, vector<1x128xf32>,
      %cst_19 = arith.constant 0.000000e+00 : f32
      %22 = vector.broadcast %cst_19 : f32 to vector<1x128xf32>
      %c0_20 = arith.constant 0 : index
      %c0_21 = arith.constant 0 : index
      %23 = vector.load %arg6[%c0_20, %c0_21] : memref<1x128xf32, #tpu.memory_space<vmem>>, vector<1x128xf32>
      tpu.vector_store %arg6[%c0_20, %c0_21], %22 {strides = array<i32>} : memref<1x128xf32, #tpu.memory_space<vmem>>, vector<1x128xf32>,
    } else {
    }
    %c0 = arith.constant 0 : index
    %c0_1 = arith.constant 0 : index
    %3 = vector.load %arg2[%c0, %c0_1] : memref<8x128xf32, #tpu.memory_space<vmem>>, vector<8x128xf32>
    %4 = arith.truncf %3 : vector<8x128xf32> to vector<8x128xbf16>
    %c0_2 = arith.constant 0 : index
    %c0_3 = arith.constant 0 : index
    %5 = vector.load %arg3[%c0_2, %c0_3] : memref<128x128xbf16, #tpu.memory_space<vmem>>, vector<128x128xbf16>
    %cst = arith.constant dense<0.000000e+00> : vector<8x128xf32>
    %6 = tpu.matmul %4, %5, %cst {dimension_numbers = #tpu.dot_dimension_numbers<[1], [0], [0], [1], [0, 0, 1, 1], [], []>} : vector<8x128xbf16>, vector<128x128xbf16>, vector<8x128xf32> -> vector<8x128xf32>
    %7 = arith.truncf %6 : vector<8x128xf32> to vector<8x128xbf16>
    %c0_4 = arith.constant 0 : index
    %c0_5 = arith.constant 0 : index
    %8 = vector.load %arg4[%c0_4, %c0_5] : memref<8x128xbf16, #tpu.memory_space<vmem>>, vector<8x128xbf16>
    tpu.vector_store %arg4[%c0_4, %c0_5], %7 {strides = array<i32>} : memref<8x128xbf16, #tpu.memory_space<vmem>>, vector<8x128xbf16>,
    %c0_6 = arith.constant 0 : index
    %c0_7 = arith.constant 0 : index
    %9 = vector.load %arg5[%c0_6, %c0_7] : memref<1x128xf32, #tpu.memory_space<vmem>>, vector<1x128xf32>
    %cst_8 = arith.constant dense<0.000000e+00> : vector<128xf32>
    %10 = vector.multi_reduction <add>, %6, %cst_8 [0] : vector<8x128xf32> to vector<128xf32>
    %11 = vector.shape_cast %10 : vector<128xf32> to vector<1x128xf32>
    %12 = arith.addf %9, %11 : vector<1x128xf32>
    %c0_9 = arith.constant 0 : index
    %c0_10 = arith.constant 0 : index
    %13 = vector.load %arg5[%c0_9, %c0_10] : memref<1x128xf32, #tpu.memory_space<vmem>>, vector<1x128xf32>
    tpu.vector_store %arg5[%c0_9, %c0_10], %12 {strides = array<i32>} : memref<1x128xf32, #tpu.memory_space<vmem>>, vector<1x128xf32>,
    %c0_11 = arith.constant 0 : index
    %c0_12 = arith.constant 0 : index
    %14 = vector.load %arg6[%c0_11, %c0_12] : memref<1x128xf32, #tpu.memory_space<vmem>>, vector<1x128xf32>
    %15 = arith.mulf %6, %6 : vector<8x128xf32>
    %cst_13 = arith.constant dense<0.000000e+00> : vector<128xf32>
    %16 = vector.multi_reduction <add>, %15, %cst_13 [0] : vector<8x128xf32> to vector<128xf32>
    %17 = vector.shape_cast %16 : vector<128xf32> to vector<1x128xf32>
    %18 = arith.addf %14, %17 : vector<1x128xf32>
    %c0_14 = arith.constant 0 : index
    %c0_15 = arith.constant 0 : index
    %19 = vector.load %arg6[%c0_14, %c0_15] : memref<1x128xf32, #tpu.memory_space<vmem>>, vector<1x128xf32>
    tpu.vector_store %arg6[%c0_14, %c0_15], %18 {strides = array<i32>} : memref<1x128xf32, #tpu.memory_space<vmem>>, vector<1x128xf32>,
    return
  }
  func.func @transform_0(%arg0: i32, %arg1: i32) -> (i32, i32) {
    %c0_i32 = arith.constant 0 : i32
    %c0_i32_0 = arith.constant 0 : i32
    return %arg1, %c0_i32 : i32, i32
  }
  func.func @transform_1(%arg0: i32, %arg1: i32) -> (i32, i32) {
    %c0_i32 = arith.constant 0 : i32
    %c0_i32_0 = arith.constant 0 : i32
    return %c0_i32, %arg0 : i32, i32
  }
  func.func @transform_2(%arg0: i32, %arg1: i32) -> (i32, i32) {
    %c0_i32 = arith.constant 0 : i32
    return %arg1, %arg0 : i32, i32
  }
  func.func @transform_3(%arg0: i32, %arg1: i32) -> (i32, i32) {
    %c0_i32 = arith.constant 0 : i32
    %c0_i32_0 = arith.constant 0 : i32
    return %c0_i32, %arg0 : i32, i32
  }
  func.func @transform_4(%arg0: i32, %arg1: i32) -> (i32, i32) {
    %c0_i32 = arith.constant 0 : i32
    %c0_i32_0 = arith.constant 0 : i32
    return %c0_i32, %arg0 : i32, i32
  }
}

</mosaic_0001>

<bundles_post_ra>
// kernel: tpu_custom_call.1
= control target key start
LH: loop header
LB: loop body
LE: loop exit
PB: predicated region body
PF: predicated region fallthrough
CT: control target
= control target key end

     0   :  { %10 = vsyncpa [#allocation3], 0  ;;  %s425_s0 = inlined_call_operand.hbm [shape: f32[8,128], index: 0, kind: input, shape index: {}]   ;;  %s426_s1 = inlined_call_operand.hbm [shape: bf16[128,128], index: 1, kind: input, shape index: {}]   ;;  %s427_s2 = inlined_call_operand.hbm [shape: bf16[8,128], index: 2, kind: output, shape index: {0}]   ;;  %s428_s3 = inlined_call_operand.hbm [shape: f32[1,128], index: 3, kind: output, shape index: {1}]   ;;  %s429_s4 = inlined_call_operand.hbm [shape: f32[1,128], index: 4, kind: output, shape index: {2}]  }
   0x1   :  { %11 = vsyncpa [#allocation6], 0 }
   0x2   :  { %12 = vsyncpa [#allocation4], 0 }
   0x3   :  { %13 = vsyncpa [#allocation9], 0  ;;  %s19_s17 = sshll.u32 %s425_s0, 4  ;;  %s377_s18 = smov [#allocation2]   ;;  %s20_s17 = int_to_ptr.hbm [resolvable:$true] %s19_s17 }
   0x4   :  { %s21_s19 = sshll.u32 %s377_s18, 4  ;;  %s29_s22 = sshll.u32 %s426_s1, 4  ;;  %s22_s19 = int_to_ptr.vmem [resolvable:$true] %s21_s19  ;;  %s30_s22 = int_to_ptr.hbm [resolvable:$true] %s29_s22 }
   0x5   :  { %24 = dma.hbm_to_vmem [thread:$0]  %s20_s17, 128, %s22_s19, [#allocation3]  }
   0x6   :  { %s378_s23 = smov [#allocation5]   ;;  %s379_s25 = smov 64  }
   0x7   :  { %s31_s24 = sshll.u32 %s378_s23, 4  ;;  %s380_s26 = smov 4   ;;  %s32_s24 = int_to_ptr.vmem [resolvable:$true] %s31_s24 }
   0x8   :  { %37 = dma.hbm_to_vmem [thread:$0]  %s30_s22, 1024, %s32_s24, [#allocation6], %s379_s25, %s379_s25, %s380_s26  }
   0x9   :  { %369 = dma.done.wait [#allocation3], 128  }
   0xa   :  { %370 = vsyncadd [#allocation3], 4294967168 }
   0xb   :  { %371 = dma.done.wait [#allocation6], 1024  }
   0xc   :  { %372 = vsyncadd [#allocation6], 4294966272  ;;  %v240_v0 = vld [vmem:[#allocation5 + $0x38] sm:$0xff]  ;;  %v239_v1 = vld [vmem:[#allocation5 + $0x30] sm:$0xff]  ;;  %v381_v10 = vmov 0.0   ;;  %s382_s0 = smov [#allocation7]  }
   0xd   :  { %118 = vmatpush.bf16.msra.mxu0 %v240_v0  ;;  %v238_v2 = vld [vmem:[#allocation5 + $0x28] sm:$0xff]  ;;  %v237_v3 = vld [vmem:[#allocation5 + $0x20] sm:$0xff]  ;;  %v236_v4 = vld [vmem:[#allocation5 + $0x18] sm:$0xff]  ;;  %50 = vst [vmem:[#allocation8] sm:$0x1] %v381_v10  ;;  %s157_s1 = sshll.u32 %s382_s0, 4  ;;  %s158_s1 = int_to_ptr.vmem [resolvable:$true] %s157_s1 }
   0xe   :  { %v235_v5 = vld [vmem:[#allocation5 + $0x10] sm:$0xff]  ;;  %v234_v6 = vld [vmem:[#allocation5 + $0x8] sm:$0xff]  ;;  %v233_v7 = vld [vmem:[#allocation5] sm:$0xff]  ;;  %51 = vst [vmem:[#allocation10] sm:$0x1] %v381_v10  ;;  %s159_s29 = sshll.u32 %s427_s2, 4  ;;  %s160_s29 = int_to_ptr.hbm [resolvable:$true] %s159_s29 }
   0xf   :  { %v52_v8 = vld [vmem:[#allocation2] sm:$0xff]  ;;  %s383_s30 = smov [#allocation8]   ;;  %s170_s7 = sshll.u32 %s428_s3, 4  ;;  %s171_s7 = int_to_ptr.hbm [resolvable:$true] %s170_s7 }
  0x10   :  { %v53_v9 = vpack.c.bf16 %v52_v8, %v52_v8  ;;  %s168_s2 = sshll.u32 %s383_s30, 4  ;;  %s384_s8 = smov [#allocation10]   ;;  %s169_s2 = int_to_ptr.vmem [resolvable:$true] %s168_s2 }
  0x11   :  { %119 = vmatpush.bf16.msra.mxu0 %v239_v1  ;;  %s179_s9 = sshll.u32 %s384_s8, 4  ;;  %s181_s12 = sshll.u32 %s429_s4, 4  ;;  %s180_s9 = int_to_ptr.vmem [resolvable:$true] %s179_s9  ;;  %s182_s12 = int_to_ptr.hbm [resolvable:$true] %s181_s12 }
  0x14   :  { %v133_v24 = vld [vmem:[#allocation8] sm:$0x1] }
  0x15   :  { %120 = vmatpush.bf16.msra.mxu0 %v238_v2  ;;  %v142_v27 = vld [vmem:[#allocation10] sm:$0x1] }
  0x19   :  { %121 = vmatpush.bf16.msra.mxu0 %v237_v3 }
  0x1d   :  { %122 = vmatpush.bf16.msra.mxu0 %v236_v4 }
  0x21   :  { %123 = vmatpush.bf16.msra.mxu0 %v235_v5 }
  0x25   :  { %124 = vmatpush.bf16.msra.mxu0 %v234_v6 }
  0x29   :  { %125 = vmatpush.bf16.msra.mxu0 %v233_v7 }
  0x2c   :  { %126 = vmatmul.bf16.vlgmr.msra.gmra.mxu0 %v53_v9 }
  0xa9   :  { %v127_v11 = vpop.f32.mrf.mxu0 }
  0xaa   :  { %v134_v12 = vrot.slane %v127_v11, 4  ;;  %v143_v13 = vmul.f32 %v127_v11, %v127_v11  ;;  %v131_v14 = vpack.c.bf16 %v127_v11, %v127_v11 }
  0xac   :  { %v135_v15 = vadd.f32 %v134_v12, %v127_v11  ;;  %v144_v16 = vrot.slane %v143_v13, 4  ;;  %132 = vst [vmem:[#allocation7] sm:$0xf] %v131_v14 }
  0xad   :  { %162 = dma.vmem_to_hbm [thread:$0]  %s158_s1, 64, %s160_s29, [#allocation4]  }
  0xae   :  { %v136_v17 = vrot.slane %v135_v15, 2  ;;  %v145_v18 = vadd.f32 %v144_v16, %v143_v13 }
  0xb0   :  { %v137_v19 = vadd.f32 %v136_v17, %v135_v15  ;;  %v146_v20 = vrot.slane %v145_v18, 2 }
  0xb1   :  { %v129_v21 = vpop.f32.mrf.mxu0 }
  0xb2   :  { %v138_v22 = vrot.slane %v137_v19, 1  ;;  %v147_v23 = vadd.f32 %v146_v20, %v145_v18 }
  0xb4   :  { %v139_v25 = vadd.f32 %v138_v22, %v137_v19  ;;  %v148_v26 = vrot.slane %v147_v23, 1 }
  0xb6   :  { %v149_v28 = vadd.f32 %v148_v26, %v147_v23  ;;  %v140_v29 = vadd.f32 %v139_v25, %v133_v24 }
  0xb8   :  { %141 = vst [vmem:[#allocation8] sm:$0x1] %v140_v29  ;;  %v150_v30 = vadd.f32 %v149_v28, %v142_v27 }
  0xb9   :  { %173 = dma.vmem_to_hbm [thread:$0]  %s169_s2, 16, %s171_s7, [#allocation9]  }
  0xba   :  { %151 = vst [vmem:[#allocation10] sm:$0x1] %v150_v30 }
  0xbb   :  { %184 = dma.vmem_to_hbm [thread:$0]  %s180_s9, 16, %s182_s12, [#allocation9]  }
  0xbc   :  { %373 = dma.done.wait [#allocation4], 64  }
  0xbd   :  { %374 = vsyncadd [#allocation4], 4294967232 }
  0xbe   :  { %375 = dma.done.wait [#allocation9], 32  }
  0xbf   :  { %376 = vsyncadd [#allocation9], 4294967264 }
  0xc0   :  { %197 = vsyncpa [#allocation3], 1 }
  0xc1   :  { %198 = vsyncpa [#allocation6], 1 }
  0xc2   :  { %199 = vsyncpa [#allocation4], 1 }
  0xc3   :  { %200 = vsyncpa [#allocation9], 1 }

// kernel: tpu_custom_call.1
= control target key start
LH: loop header
LB: loop body
LE: loop exit
PB: predicated region body
PF: predicated region fallthrough
CT: control target
= control target key end

     0   :  { %10 = vsyncpa [#allocation3], 0  ;;  %s425_s0 = inlined_call_operand.hbm [shape: f32[8,128], index: 0, kind: input, shape index: {}]   ;;  %s426_s1 = inlined_call_operand.hbm [shape: bf16[128,128], index: 1, kind: input, shape index: {}]   ;;  %s427_s2 = inlined_call_operand.hbm [shape: bf16[8,128], index: 2, kind: output, shape index: {0}]   ;;  %s428_s3 = inlined_call_operand.hbm [shape: f32[1,128], index: 3, kind: output, shape index: {1}]   ;;  %s429_s4 = inlined_call_operand.hbm [shape: f32[1,128], index: 4, kind: output, shape index: {2}]  }
   0x1   :  { %11 = vsyncpa [#allocation6], 0 }
   0x2   :  { %12 = vsyncpa [#allocation4], 0 }
   0x3   :  { %13 = vsyncpa [#allocation9], 0  ;;  %s19_s17 = sshll.u32 %s425_s0, 4  ;;  %s377_s18 = smov [#allocation2]   ;;  %s20_s17 = int_to_ptr.hbm [resolvable:$true] %s19_s17 }
   0x4   :  { %s21_s19 = sshll.u32 %s377_s18, 4  ;;  %s29_s22 = sshll.u32 %s426_s1, 4  ;;  %s22_s19 = int_to_ptr.vmem [resolvable:$true] %s21_s19  ;;  %s30_s22 = int_to_ptr.hbm [resolvable:$true] %s29_s22 }
   0x5   :  { %24 = dma.hbm_to_vmem [thread:$0]  %s20_s17, 128, %s22_s19, [#allocation3]  }
   0x6   :  { %s378_s23 = smov [#allocation5]   ;;  %s379_s25 = smov 64  }
   0x7   :  { %s31_s24 = sshll.u32 %s378_s23, 4  ;;  %s380_s26 = smov 4   ;;  %s32_s24 = int_to_ptr.vmem [resolvable:$true] %s31_s24 }
   0x8   :  { %37 = dma.hbm_to_vmem [thread:$0]  %s30_s22, 1024, %s32_s24, [#allocation6], %s379_s25, %s379_s25, %s380_s26  }
   0x9   :  { %369 = dma.done.wait [#allocation3], 128  }
   0xa   :  { %370 = vsyncadd [#allocation3], 4294967168 }
   0xb   :  { %371 = dma.done.wait [#allocation6], 1024  }
   0xc   :  { %372 = vsyncadd [#allocation6], 4294966272  ;;  %v240_v0 = vld [vmem:[#allocation5 + $0x38] sm:$0xff]  ;;  %v239_v1 = vld [vmem:[#allocation5 + $0x30] sm:$0xff]  ;;  %v381_v10 = vmov 0.0   ;;  %s382_s0 = smov [#allocation7]  }
   0xd   :  { %118 = vmatpush.bf16.msra.mxu0 %v240_v0  ;;  %v238_v2 = vld [vmem:[#allocation5 + $0x28] sm:$0xff]  ;;  %v237_v3 = vld [vmem:[#allocation5 + $0x20] sm:$0xff]  ;;  %v236_v4 = vld [vmem:[#allocation5 + $0x18] sm:$0xff]  ;;  %50 = vst [vmem:[#allocation8] sm:$0x1] %v381_v10  ;;  %s157_s1 = sshll.u32 %s382_s0, 4  ;;  %s158_s1 = int_to_ptr.vmem [resolvable:$true] %s157_s1 }
   0xe   :  { %v235_v5 = vld [vmem:[#allocation5 + $0x10] sm:$0xff]  ;;  %v234_v6 = vld [vmem:[#allocation5 + $0x8] sm:$0xff]  ;;  %v233_v7 = vld [vmem:[#allocation5] sm:$0xff]  ;;  %51 = vst [vmem:[#allocation10] sm:$0x1] %v381_v10  ;;  %s159_s29 = sshll.u32 %s427_s2, 4  ;;  %s160_s29 = int_to_ptr.hbm [resolvable:$true] %s159_s29 }
   0xf   :  { %v52_v8 = vld [vmem:[#allocation2] sm:$0xff]  ;;  %s383_s30 = smov [#allocation8]   ;;  %s170_s7 = sshll.u32 %s428_s3, 4  ;;  %s171_s7 = int_to_ptr.hbm [resolvable:$true] %s170_s7 }
  0x10   :  { %v53_v9 = vpack.c.bf16 %v52_v8, %v52_v8  ;;  %s168_s2 = sshll.u32 %s383_s30, 4  ;;  %s384_s8 = smov [#allocation10]   ;;  %s169_s2 = int_to_ptr.vmem [resolvable:$true] %s168_s2 }
  0x11   :  { %119 = vmatpush.bf16.msra.mxu0 %v239_v1  ;;  %s179_s9 = sshll.u32 %s384_s8, 4  ;;  %s181_s12 = sshll.u32 %s429_s4, 4  ;;  %s180_s9 = int_to_ptr.vmem [resolvable:$true] %s179_s9  ;;  %s182_s12 = int_to_ptr.hbm [resolvable:$true] %s181_s12 }
  0x14   :  { %v133_v24 = vld [vmem:[#allocation8] sm:$0x1] }
  0x15   :  { %120 = vmatpush.bf16.msra.mxu0 %v238_v2  ;;  %v142_v27 = vld [vmem:[#allocation10] sm:$0x1] }
  0x19   :  { %121 = vmatpush.bf16.msra.mxu0 %v237_v3 }
  0x1d   :  { %122 = vmatpush.bf16.msra.mxu0 %v236_v4 }
  0x21   :  { %123 = vmatpush.bf16.msra.mxu0 %v235_v5 }
  0x25   :  { %124 = vmatpush.bf16.msra.mxu0 %v234_v6 }
  0x29   :  { %125 = vmatpush.bf16.msra.mxu0 %v233_v7 }
  0x2c   :  { %126 = vmatmul.bf16.vlgmr.msra.gmra.mxu0 %v53_v9 }
  0xa9   :  { %v127_v11 = vpop.f32.mrf.mxu0 }
  0xaa   :  { %v134_v12 = vrot.slane %v127_v11, 4  ;;  %v143_v13 = vmul.f32 %v127_v11, %v127_v11  ;;  %v131_v14 = vpack.c.bf16 %v127_v11, %v127_v11 }
  0xac   :  { %v135_v15 = vadd.f32 %v134_v12, %v127_v11  ;;  %v144_v16 = vrot.slane %v143_v13, 4  ;;  %132 = vst [vmem:[#allocation7] sm:$0xf] %v131_v14 }
  0xad   :  { %162 = dma.vmem_to_hbm [thread:$0]  %s158_s1, 64, %s160_s29, [#allocation4]  }
  0xae   :  { %v136_v17 = vrot.slane %v135_v15, 2  ;;  %v145_v18 = vadd.f32 %v144_v16, %v143_v13 }
  0xb0   :  { %v137_v19 = vadd.f32 %v136_v17, %v135_v15  ;;  %v146_v20 = vrot.slane %v145_v18, 2 }
  0xb1   :  { %v129_v21 = vpop.f32.mrf.mxu0 }
  0xb2   :  { %v138_v22 = vrot.slane %v137_v19, 1  ;;  %v147_v23 = vadd.f32 %v146_v20, %v145_v18 }
  0xb4   :  { %v139_v25 = vadd.f32 %v138_v22, %v137_v19  ;;  %v148_v26 = vrot.slane %v147_v23, 1 }
  0xb6   :  { %v149_v28 = vadd.f32 %v148_v26, %v147_v23  ;;  %v140_v29 = vadd.f32 %v139_v25, %v133_v24 }
  0xb8   :  { %141 = vst [vmem:[#allocation8] sm:$0x1] %v140_v29  ;;  %v150_v30 = vadd.f32 %v149_v28, %v142_v27 }
  0xb9   :  { %173 = dma.vmem_to_hbm [thread:$0]  %s169_s2, 16, %s171_s7, [#allocation9]  }
  0xba   :  { %151 = vst [vmem:[#allocation10] sm:$0x1] %v150_v30 }
  0xbb   :  { %184 = dma.vmem_to_hbm [thread:$0]  %s180_s9, 16, %s182_s12, [#allocation9]  }
  0xbc   :  { %373 = dma.done.wait [#allocation4], 64  }
  0xbd   :  { %374 = vsyncadd [#allocation4], 4294967232 }
  0xbe   :  { %375 = dma.done.wait [#allocation9], 32  }
  0xbf   :  { %376 = vsyncadd [#allocation9], 4294967264 }
  0xc0   :  { %197 = vsyncpa [#allocation3], 1 }
  0xc1   :  { %198 = vsyncpa [#allocation6], 1 }
  0xc2   :  { %199 = vsyncpa [#allocation4], 1 }
  0xc3   :  { %200 = vsyncpa [#allocation9], 1 }

</bundles_post_ra>
